<compile_context>
chip_gen: v7x
topology: tpu7x:2x2x1
jax: 0.10.0
libtpu: 0.0.40
codegen_flags: <defaults>
</compile_context>

<pallas_src>
import functools

import jax
import jax.numpy as jnp
from jax.experimental import pallas as pl
from jax.experimental.pallas import tpu as pltpu

EPS = 1e-6  # torch.nn.functional.pairwise_distance default eps (added to diff)


def _round_up(x, m):
    return (x + m - 1) // m * m


def _chip_config():
    """Returns (vmem_budget_bytes, vmem_limit_bytes_or_None, is_v7x, has_bf16_vpu)."""
    kind = ""
    try:
        kind = jax.devices()[0].device_kind.lower().replace(" ", "")
    except Exception:
        pass
    if "v5lite" in kind or "v5e" in kind:
        # v5e: 16 MiB scoped-VMEM default, no bf16 VPU.  At ~0.8 TB/s there is
        # no roofline reason to go beyond ~2 MiB/input tiles.
        return 11 << 20, None, False, False
    if "v7" in kind or "tpu7" in kind:
        # v7x: 64 MiB physical VMEM, 2 TensorCores, ~3.2 TB/s -> big tiles and
        # an explicit scoped-VMEM limit with headroom under the physical cap.
        return 38 << 20, 48 << 20, True, True
    if "v6" in kind:
        # v6e: 32 MiB scoped default is enough; single TensorCore; bf16 VPU.
        return 24 << 20, None, False, True
    # Unknown / older generation: conservative (fits a 16 MiB scoped default).
    return 11 << 20, None, False, False


def _contrastive_loss_kernel(scalar_ref, o1_ref, o2_ref, label_ref, seg_ref,
                             out_ref, *, total_rows, tile_rows, groups,
                             sub_in_native):
    pid = pl.program_id(0)
    margin = scalar_ref[0]                                    # f32 scalar (SMEM)

    o1 = o1_ref[...]                                          # (tile_rows, W)
    o2 = o2_ref[...]
    if sub_in_native:
        # bf16 subtract packs 2 elems/lane and drops two f32 upcasts; EPS is
        # added after the upcast because 1e-6 underflows in bf16.
        diff = (o1 - o2).astype(jnp.float32) + EPS
    else:
        diff = o1.astype(jnp.float32) - o2.astype(jnp.float32) + EPS

    sq = diff * diff                                          # (tile_rows, W) f32
    if groups == 1:
        sq_sum = jnp.sum(sq, axis=-1, keepdims=True)          # (tile_rows, 1)
    else:
        # Segmented reduce on the otherwise-idle MXU: (tile_rows, W) @ (W, g)
        # against a 0/1 segment matrix recovers per-original-row d^2.
        sq_sum = jnp.dot(sq, seg_ref[...],
                         precision=jax.lax.Precision.HIGHEST,
                         preferred_element_type=jnp.float32)  # (tile_rows, g)
    d = jnp.sqrt(sq_sum)

    lbl = label_ref[...]                                      # (tile_rows, g) f32
    hinge = jnp.maximum(margin - d, 0.0)
    # Positive term uses sq_sum (== d^2) directly: no dependence on the sqrt.
    per = (1.0 - lbl) * sq_sum + lbl * (hinge * hinge)

    # Mask padded rows of a ragged last tile (block padding is unspecified;
    # jnp.where is a select, so NaN/Inf garbage in masked rows cannot leak).
    rows = pid * tile_rows + jax.lax.broadcasted_iota(jnp.int32, per.shape, 0)
    per = jnp.where(rows < total_rows, per, 0.0)

    # Per-block partial sum broadcast over a full (8,128) slab -> unmasked
    # lane-dense store; the wrapper reads element [:, 0, 0].
    out_ref[...] = jnp.full(out_ref.shape, jnp.sum(per), dtype=out_ref.dtype)


def contrastive_loss(output1, output2, label, margin=2.0):
    B, D = output1.shape
    in_dtype = output1.dtype
    itemsize = jnp.dtype(in_dtype).itemsize
    vmem_budget, vmem_limit, is_v7x, has_bf16_vpu = _chip_config()

    # --- Lane-dense packing for small feature dims (free row-major reshape) ---
    g = 1
    if D < 128:
        g = max(1, 128 // D)
        while g > 1 and B % g:          # only pack when the reshape is free
            g -= 1
    rows_total = B // g
    W = g * D
    o1 = output1.reshape(rows_total, W)
    o2 = output2.reshape(rows_total, W)
    lbl = label.reshape(rows_total, g).astype(jnp.float32)
    # 0/1 segment matrix for the per-original-row reduce (resident: constant
    # block index -> DMA'd once).
    seg = (jnp.arange(W, dtype=jnp.int32)[:, None] // D
           == jnp.arange(g, dtype=jnp.int32)[None, :]).astype(jnp.float32)

    # --- Tile rows from the per-chip VMEM byte budget (padded/upcast bytes) ---
    # TODO(synk): for feature widths where even 8 rows blow the budget, add a
    # second grid axis over W with a per-row sq_sum accumulator.
    pW = _round_up(W, 128)                        # lane-padded row width
    per_row_bytes = (4 * pW * itemsize            # 2 inputs x 2 pipeline buffers
                     + 14 * pW                    # ~3.5 live f32 intermediates
                     + 2 * 128 * 4)               # label block (lane-padded) x 2
    tile_rows = max(8, min(8192, vmem_budget // per_row_bytes // 8 * 8))
    tile_rows = min(tile_rows, _round_up(rows_total, 8))
    grid_b = pl.cdiv(rows_total, tile_rows)
    if grid_b > 1:                                # roughly even tiles
        tile_rows = _round_up(pl.cdiv(rows_total, grid_b), 8)
        grid_b = pl.cdiv(rows_total, tile_rows)
    if is_v7x:                                    # load-balance both TensorCores
        if grid_b == 1 and rows_total > 8:
            tile_rows = _round_up(pl.cdiv(rows_total, 2), 8)
        elif grid_b > 2 and grid_b % 2:
            tile_rows = _round_up(pl.cdiv(rows_total, grid_b + 1), 8)
        grid_b = pl.cdiv(rows_total, tile_rows)

    sub_in_native = bool(has_bf16_vpu and in_dtype == jnp.bfloat16)
    scalars = jnp.array([margin], dtype=jnp.float32)

    kernel = functools.partial(_contrastive_loss_kernel,
                               total_rows=rows_total, tile_rows=tile_rows,
                               groups=g, sub_in_native=sub_in_native)

    partials = pl.pallas_call(
        kernel,
        out_shape=jax.ShapeDtypeStruct((grid_b, 8, 128), jnp.float32),
        grid=(grid_b,),
        in_specs=[
            pl.BlockSpec(memory_space=pltpu.MemorySpace.SMEM),   # margin scalar
            pl.BlockSpec((tile_rows, W), lambda i: (i, 0)),      # output1 tile
            pl.BlockSpec((tile_rows, W), lambda i: (i, 0)),      # output2 tile
            pl.BlockSpec((tile_rows, g), lambda i: (i, 0)),      # label tile
            pl.BlockSpec((W, g), lambda i: (0, 0)),              # segment matrix
        ],
        out_specs=pl.BlockSpec((1, 8, 128), lambda i: (i, 0, 0)),
        compiler_params=pltpu.CompilerParams(
            dimension_semantics=("parallel",),
            vmem_limit_bytes=vmem_limit),
        cost_estimate=pl.CostEstimate(
            flops=8 * B * D,
            transcendentals=B,
            bytes_accessed=(output1.nbytes + output2.nbytes + B * 4
                            + seg.nbytes + grid_b * 8 * 128 * 4)),
        # TODO(synk): sweep pipeline_mode=pl.Buffered(3) on the two input specs
        # only if a trace shows exposed DMA at step boundaries.
    )(scalars, o1, o2, lbl, seg)

    # Final mean over the TOTAL (original) batch size.
    return jnp.sum(partials[:, 0, 0]) / B


def _reference(o1, o2, label, margin=2.0):
    o1 = o1.astype(jnp.float32)
    o2 = o2.astype(jnp.float32)
    d = jnp.sqrt(jnp.sum((o1 - o2 + EPS) ** 2, axis=-1))
    return jnp.mean((1.0 - label) * d ** 2
                    + label * jnp.maximum(margin - d, 0.0) ** 2)


if __name__ == "__main__":
    # Case 1: small f32 problem, D < 128 -> lane-dense packed path (g = 4).
    k1, k2, k3 = jax.random.split(jax.random.PRNGKey(0), 3)
    B, D = 8, 32
    o1 = jax.random.normal(k1, (B, D), dtype=jnp.float32)
    o2 = jax.random.normal(k2, (B, D), dtype=jnp.float32)
    label = jax.random.bernoulli(k3, 0.5, (B,)).astype(jnp.float32)

    loss = jax.block_until_ready(contrastive_loss(o1, o2, label))
    ref = _reference(o1, o2, label)
    assert jnp.allclose(loss, ref, rtol=1e-5, atol=1e-5), (loss, ref)

    # Case 2: ragged packed batch + non-default margin (exercises the row mask
    # and the SMEM margin scalar).
    k4, k5, k6 = jax.random.split(jax.random.PRNGKey(1), 3)
    B2, D2 = 12, 32
    o1b = jax.random.normal(k4, (B2, D2), dtype=jnp.float32)
    o2b = jax.random.normal(k5, (B2, D2), dtype=jnp.float32)
    lab2 = jax.random.bernoulli(k6, 0.5, (B2,)).astype(jnp.float32)

    loss2 = jax.block_until_ready(contrastive_loss(o1b, o2b, lab2, margin=1.5))
    ref2 = _reference(o1b, o2b, lab2, margin=1.5)
    assert jnp.allclose(loss2, ref2, rtol=1e-5, atol=1e-5), (loss2, ref2)

    # Case 3: bf16 inputs streamed natively; on v6e/v7x the subtract runs in
    # bf16 (matches PyTorch-bf16 behaviour), so compare against the f32
    # reference at bf16-level tolerance.
    o1c, o2c = o1.astype(jnp.bfloat16), o2.astype(jnp.bfloat16)
    loss3 = jax.block_until_ready(contrastive_loss(o1c, o2c, label))
    ref3 = _reference(o1c, o2c, label)
    assert jnp.allclose(loss3, ref3, rtol=1e-2, atol=1e-2), (loss3, ref3)

    # Case 4: D >= 128 -> unpacked path (g = 1), ragged batch.
    k7, k8, k9 = jax.random.split(jax.random.PRNGKey(2), 3)
    B4, D4 = 12, 256
    o1d = jax.random.normal(k7, (B4, D4), dtype=jnp.float32)
    o2d = jax.random.normal(k8, (B4, D4), dtype=jnp.float32)
    lab4 = jax.random.bernoulli(k9, 0.5, (B4,)).astype(jnp.float32)

    loss4 = jax.block_until_ready(contrastive_loss(o1d, o2d, lab4))
    ref4 = _reference(o1d, o2d, lab4)
    assert jnp.allclose(loss4, ref4, rtol=1e-5, atol=1e-5), (loss4, ref4)

    print("KERNEL_OK")
</pallas_src>

<mosaic_0001>
module attributes {stable_mosaic.version = 11 : i64} {
  func.func @_contrastive_loss_kernel(%arg0: i32, %arg1: memref<1xf32, #tpu.memory_space<smem>>, %arg2: memref<8x128xf32, #tpu.memory_space<vmem>>, %arg3: memref<8x128xf32, #tpu.memory_space<vmem>>, %arg4: memref<8x4xf32, #tpu.memory_space<vmem>>, %arg5: memref<128x4xf32, #tpu.memory_space<vmem>>, %arg6: memref<1x8x128xf32, #tpu.memory_space<vmem>>) attributes {dimension_semantics = [#tpu.dimension_semantics<parallel>], iteration_bounds = array<i64: 1>, scalar_prefetch = 0 : i64, scratch_operands = 0 : i64, tpu.core_type = #tpu.core_type<tc>, window_params = [{transform_indices = @transform_0, window_bounds = array<i64: 1>}, {transform_indices = @transform_1, window_bounds = array<i64: 8, 128>}, {transform_indices = @transform_2, window_bounds = array<i64: 8, 128>}, {transform_indices = @transform_3, window_bounds = array<i64: 8, 4>}, {pipeline_mode = #tpu.pipeline_mode<synchronous>, transform_indices = @transform_4, window_bounds = array<i64: 128, 4>}, {transform_indices = @transform_5, window_bounds = array<i64: 1, 8, 128>}]} {
    %c0 = arith.constant 0 : index
    %0 = memref.load %arg1[%c0] : memref<1xf32, #tpu.memory_space<smem>>
    %c0_0 = arith.constant 0 : index
    %c0_1 = arith.constant 0 : index
    %1 = vector.load %arg2[%c0_0, %c0_1] : memref<8x128xf32, #tpu.memory_space<vmem>>, vector<8x128xf32>
    %c0_2 = arith.constant 0 : index
    %c0_3 = arith.constant 0 : index
    %2 = vector.load %arg3[%c0_2, %c0_3] : memref<8x128xf32, #tpu.memory_space<vmem>>, vector<8x128xf32>
    %3 = arith.subf %1, %2 : vector<8x128xf32>
    %cst = arith.constant 9.99999997E-7 : f32
    %4 = vector.broadcast %cst : f32 to vector<8x128xf32>
    %5 = arith.addf %3, %4 : vector<8x128xf32>
    %6 = arith.mulf %5, %5 : vector<8x128xf32>
    %c0_4 = arith.constant 0 : index
    %c0_5 = arith.constant 0 : index
    %7 = vector.load %arg5[%c0_4, %c0_5] : memref<128x4xf32, #tpu.memory_space<vmem>>, vector<128x4xf32>
    %cst_6 = arith.constant dense<0.000000e+00> : vector<8x4xf32>
    %8 = tpu.matmul %6, %7, %cst_6 {dimension_numbers = #tpu.dot_dimension_numbers<[1], [0], [0], [1], [0, 0, 1, 1], [], []>, precision = #tpu.contract_precision<fp32>} : vector<8x128xf32>, vector<128x4xf32>, vector<8x4xf32> -> vector<8x4xf32>
    %9 = math.sqrt %8 : vector<8x4xf32>
    %c0_7 = arith.constant 0 : index
    %c0_8 = arith.constant 0 : index
    %10 = vector.load %arg4[%c0_7, %c0_8] : memref<8x4xf32, #tpu.memory_space<vmem>>, vector<8x4xf32>
    %11 = vector.broadcast %0 : f32 to vector<8x4xf32>
    %12 = arith.subf %11, %9 : vector<8x4xf32>
    %cst_9 = arith.constant 0.000000e+00 : f32
    %13 = vector.broadcast %cst_9 : f32 to vector<8x4xf32>
    %14 = arith.maximumf %12, %13 : vector<8x4xf32>
    %cst_10 = arith.constant 1.000000e+00 : f32
    %15 = vector.broadcast %cst_10 : f32 to vector<8x4xf32>
    %16 = arith.subf %15, %10 : vector<8x4xf32>
    %17 = arith.mulf %16, %8 : vector<8x4xf32>
    %18 = arith.mulf %14, %14 : vector<8x4xf32>
    %19 = arith.mulf %10, %18 : vector<8x4xf32>
    %20 = arith.addf %17, %19 : vector<8x4xf32>
    %c8_i32 = arith.constant 8 : i32
    %21 = arith.muli %arg0, %c8_i32 : i32
    %22 = tpu.iota {dimensions = array<i32: 0>} : vector<8x4xi32>
    %23 = vector.broadcast %21 : i32 to vector<8x4xi32>
    %24 = arith.addi %23, %22 : vector<8x4xi32>
    %c2_i32 = arith.constant 2 : i32
    %25 = vector.broadcast %c2_i32 : i32 to vector<8x4xi32>
    %26 = arith.cmpi slt, %24, %25 : vector<8x4xi32>
    %cst_11 = arith.constant 0.000000e+00 : f32
    %27 = vector.broadcast %cst_11 : f32 to vector<8x4xf32>
    %28 = arith.select %26, %20, %27 : vector<8x4xi1>, vector<8x4xf32>
    %29 = vector.shape_cast %28 : vector<8x4xf32> to vector<1x8x4xf32>
    %cst_12 = arith.constant dense<0.000000e+00> : vector<1xf32>
    %30 = vector.multi_reduction <add>, %29, %cst_12 [1, 2] : vector<1x8x4xf32> to vector<1xf32>
    %31 = vector.shape_cast %30 : vector<1xf32> to vector<1x1x1xf32>
    %32 = vector.extract %31[0, 0, 0] : f32 from vector<1x1x1xf32>
    %33 = vector.broadcast %32 : f32 to vector<1x8x128xf32>
    %c0_13 = arith.constant 0 : index
    %c0_14 = arith.constant 0 : index
    %c0_15 = arith.constant 0 : index
    %34 = vector.load %arg6[%c0_13, %c0_14, %c0_15] : memref<1x8x128xf32, #tpu.memory_space<vmem>>, vector<1x8x128xf32>
    tpu.vector_store %arg6[%c0_13, %c0_14, %c0_15], %33 {strides = array<i32>} : memref<1x8x128xf32, #tpu.memory_space<vmem>>, vector<1x8x128xf32>,
    return
  }
  func.func @transform_0(%arg0: i32) -> i32 {
    %c0_i32 = arith.constant 0 : i32
    %c0_i32_0 = arith.constant 0 : i32
    return %c0_i32 : i32
  }
  func.func @transform_1(%arg0: i32) -> (i32, i32) {
    %c0_i32 = arith.constant 0 : i32
    %c0_i32_0 = arith.constant 0 : i32
    return %arg0, %c0_i32 : i32, i32
  }
  func.func @transform_2(%arg0: i32) -> (i32, i32) {
    %c0_i32 = arith.constant 0 : i32
    %c0_i32_0 = arith.constant 0 : i32
    return %arg0, %c0_i32 : i32, i32
  }
  func.func @transform_3(%arg0: i32) -> (i32, i32) {
    %c0_i32 = arith.constant 0 : i32
    %c0_i32_0 = arith.constant 0 : i32
    return %arg0, %c0_i32 : i32, i32
  }
  func.func @transform_4(%arg0: i32) -> (i32, i32) {
    %c0_i32 = arith.constant 0 : i32
    %c0_i32_0 = arith.constant 0 : i32
    %c0_i32_1 = arith.constant 0 : i32
    return %c0_i32, %c0_i32_0 : i32, i32
  }
  func.func @transform_5(%arg0: i32) -> (i32, i32, i32) {
    %c0_i32 = arith.constant 0 : i32
    %c0_i32_0 = arith.constant 0 : i32
    %c0_i32_1 = arith.constant 0 : i32
    return %arg0, %c0_i32, %c0_i32_0 : i32, i32, i32
  }
}

</mosaic_0001>

<bundles_post_ra>
// kernel: tpu_custom_call.1
= control target key start
LH: loop header
LB: loop body
LE: loop exit
PB: predicated region body
PF: predicated region fallthrough
CT: control target
= control target key end

     0   :  { %v1232_v3 = vmov 0.0|0.0   ;;  %vm1233_vm0 = vmmov 0   ;;  %v1234_v11 = vmov 0.0   ;;  %s1601_s0 = inlined_call_operand.<no memory space> [shape: f32[1], index: 0, kind: input, shape index: {}]   ;;  %s1602_s1 = inlined_call_operand.vmem [shape: f32[2,128], index: 1, kind: input, shape index: {}]   ;;  %s1603_s2 = inlined_call_operand.vmem [shape: f32[2,128], index: 2, kind: input, shape index: {}]   ;;  %s1604_s3 = inlined_call_operand.vmem [shape: f32[2,4], index: 3, kind: input, shape index: {}]   ;;  %s1605_s4 = inlined_call_operand.vmem [shape: f32[128,4], index: 4, kind: input, shape index: {}]   ;;  %s1606_s5 = inlined_call_operand.hbm [shape: f32[1,8,128], index: 5, kind: output, shape index: {}]  }
   0x1   :  { %v28_v0 = vld [vmem:[%s1605_s4] sm:$0xff]  ;;  %v29_v1 = vld [vmem:[%s1605_s4 + $0x8] sm:$0xff]  ;;  %v30_v2 = vld [vmem:[%s1605_s4 + $0x10] sm:$0xff]  ;;  %1047 = vmatprep.subr.bf16.mxu1 %v1232_v3  ;;  %1119 = vmatprep.subr.bf16.mxu0 %v1232_v3 }
   0x2   :  { %v45_v4 = vand.u32 4294901760, %v28_v0  ;;  %v48_v5 = vand.u32 4294901760, %v29_v1  ;;  %v31_v6 = vld [vmem:[%s1605_s4 + $0x18] sm:$0xff]  ;;  %v51_v7 = vand.u32 4294901760, %v30_v2  ;;  %v1283_v9 = vld [vmem:[%s1605_s4 + $0x20] sm:$0xff]  ;;  %v1288_v10 = vld [vmem:[%s1605_s4 + $0x28] sm:$0xff]  ;;  %869 = vmatprep.mubr.msk.f32.mxu1 %vm1233_vm0, %v1234_v11  ;;  %974 = vmatprep.mubr.msk.f32.mxu0 %vm1233_vm0, %v1234_v11 }
   0x3   :  { %v54_v8 = vand.u32 4294901760, %v31_v6  ;;  %v57_v14 = vand.u32 4294901760, %v1283_v9  ;;  %v60_v15 = vand.u32 4294901760, %v1288_v10  ;;  %v1307_v16 = vld [vmem:[%s1605_s4 + $0x30] sm:$0xff]  ;;  %v1312_v17 = vld [vmem:[%s1605_s4 + $0x38] sm:$0xff] }
   0x4   :  { %v1294_v12 = vpack.c.bf16 %v48_v5, %v45_v4 }
   0x5   :  { %v1298_v13 = vpack.c.bf16 %v54_v8, %v51_v7 }
   0x6   :  { %1049 = vmatpush3.bf16.msra.mxu1 %v1294_v12  ;;  %1121 = vmatpush3.bf16.msra.mxu0 %v1294_v12 }
   0x7   :  { %1050 = vmatprep.subr.bf16.mxu1 %v1232_v3  ;;  %1122 = vmatprep.subr.bf16.mxu0 %v1232_v3 }
   0x8   :  { %11 = vsyncpa [#allocation4], 0  ;;  %v23_v18 = vld [vmem:[%s1602_s1] sm:$0xff]  ;;  %v1322_v20 = vpack.c.bf16 %v60_v15, %v57_v14  ;;  %v63_v21 = vand.u32 4294901760, %v1307_v16  ;;  %v66_v22 = vand.u32 4294901760, %v1312_v17  ;;  %v1336_v24 = vld [vmem:[%s1605_s4 + $0x48] sm:$0xff]  ;;  %v1356_v33 = vsub.f32 %v28_v0, %v45_v4 }
   0x9   :  { %v24_v19 = vld [vmem:[%s1603_s2] sm:$0xff]  ;;  %v72_v29 = vand.u32 4294901760, %v1336_v24  ;;  %v1349_v30 = vld [vmem:[%s1605_s4 + $0x50] sm:$0xff]  ;;  %v1354_v31 = vld [vmem:[%s1605_s4 + $0x58] sm:$0xff]  ;;  %v1360_v35 = vsub.f32 %v29_v1, %v48_v5  ;;  %v1380_v41 = vsub.f32 %v30_v2, %v51_v7  ;;  %v1382_v42 = vsub.f32 %v31_v6, %v54_v8 }
   0xa   :  { %1052 = vmatpush3.bf16.msra.mxu1 %v1298_v13  ;;  %1124 = vmatpush3.bf16.msra.mxu0 %v1298_v13  ;;  %v1331_v23 = vld [vmem:[%s1605_s4 + $0x40] sm:$0xff]  ;;  %v25_v25 = vsub.f32 %v23_v18, %v24_v19  ;;  %v1340_v27 = vpack.c.bf16 %v66_v22, %v63_v21  ;;  %v75_v37 = vand.u32 4294901760, %v1349_v30  ;;  %v78_v38 = vand.u32 4294901760, %v1354_v31  ;;  %v1378_v40 = vld [vmem:[%s1605_s4 + $0x68] sm:$0xff]  ;;  %v1400_v47 = vld [vmem:[%s1605_s4 + $0x70] sm:$0xff] }
   0xb   :  { %1053 = vmatprep.subr.bf16.mxu1 %v1232_v3  ;;  %1125 = vmatprep.subr.bf16.mxu0 %v1232_v3  ;;  %v69_v28 = vand.u32 4294901760, %v1331_v23  ;;  %v1371_v39 = vld [vmem:[%s1605_s4 + $0x60] sm:$0xff]  ;;  %v84_v46 = vand.u32 4294901760, %v1378_v40  ;;  %v1405_v48 = vld [vmem:[%s1605_s4 + $0x78] sm:$0xff]  ;;  %v138_v49 = vand.u32 4294901760, %v1356_v33  ;;  %v145_v50 = vand.u32 4294901760, %v1360_v35 }
   0xc   :  { %v26_v26 = vadd.f32 1e-06, %v25_v25  ;;  %v81_v43 = vand.u32 4294901760, %v1371_v39  ;;  %v1394_v45 = vpack.c.bf16 %v78_v38, %v75_v37  ;;  %v1412_v51 = vsub.f32 %v1283_v9, %v57_v14 }
   0xd   :  { %v1364_v36 = vpack.c.bf16 %v72_v29, %v69_v28  ;;  %v1415_v52 = vsub.f32 %v1288_v10, %v60_v15  ;;  %v87_v53 = vand.u32 4294901760, %v1400_v47  ;;  %v90_v54 = vand.u32 4294901760, %v1405_v48 }
   0xe   :  { %1055 = vmatpush3.bf16.msra.mxu1 %v1322_v20  ;;  %1127 = vmatpush3.bf16.msra.mxu0 %v1322_v20  ;;  %v27_v32 = vmul.f32 %v26_v26, %v26_v26  ;;  %v152_v56 = vand.u32 4294901760, %v1380_v41  ;;  %v1427_v57 = vpack.c.bf16 %v84_v46, %v81_v43  ;;  %v139_v58 = vsub.f32 %v1356_v33, %v138_v49 }
   0xf   :  { %1056 = vmatprep.subr.bf16.mxu1 %v1232_v3  ;;  %1128 = vmatprep.subr.bf16.mxu0 %v1232_v3  ;;  %v146_v59 = vsub.f32 %v1360_v35, %v145_v50  ;;  %v159_v60 = vand.u32 4294901760, %v1382_v42  ;;  %v1435_v61 = vsub.f32 %v1307_v16, %v63_v21  ;;  %v1438_v62 = vsub.f32 %v1312_v17, %v66_v22 }
  0x10   :  { %v1358_v34 = vand.u32 4294901760, %v27_v32  ;;  %v153_v0 = vsub.f32 %v1380_v41, %v152_v56  ;;  %v166_v1 = vand.u32 4294901760, %v1412_v51  ;;  %v173_v2 = vand.u32 4294901760, %v1415_v52 }
  0x11   :  { %v1450_v4 = vpack.c.bf16 %v90_v54, %v87_v53  ;;  %v140_v5 = vand.u32 4294901760, %v139_v58  ;;  %v147_v6 = vand.u32 4294901760, %v146_v59  ;;  %v160_v7 = vsub.f32 %v1382_v42, %v159_v60 }
  0x12   :  { %1058 = vmatpush3.bf16.msra.mxu1 %v1340_v27  ;;  %1130 = vmatpush3.bf16.msra.mxu0 %v1340_v27  ;;  %v1386_v44 = vsub.f32 %v27_v32, %v1358_v34  ;;  %v1456_v8 = vsub.f32 %v1331_v23, %v69_v28  ;;  %v1459_v9 = vsub.f32 %v1336_v24, %v72_v29  ;;  %v154_v15 = vand.u32 4294901760, %v153_v0 }
  0x13   :  { %1059 = vmatprep.subr.bf16.mxu1 %v1232_v3  ;;  %1131 = vmatprep.subr.bf16.mxu0 %v1232_v3  ;;  %v1144_v10 = vpack.c.bf16 %v145_v50, %v138_v49  ;;  %v167_v16 = vsub.f32 %v1412_v51, %v166_v1  ;;  %v174_v17 = vsub.f32 %v1415_v52, %v173_v2  ;;  %v161_v19 = vand.u32 4294901760, %v160_v7 }
  0x14   :  { %v127_v55 = vand.u32 4294901760, %v1386_v44  ;;  %v1072_v18 = vpack.c.bf16 %v147_v6, %v140_v5  ;;  %v180_v21 = vand.u32 4294901760, %v1435_v61  ;;  %v187_v22 = vand.u32 4294901760, %v1438_v62 }
  0x15   :  { %v1472_v23 = vsub.f32 %v1349_v30, %v75_v37  ;;  %v1477_v24 = vsub.f32 %v1354_v31, %v78_v38  ;;  %v1147_v25 = vpack.c.bf16 %v159_v60, %v152_v56  ;;  %v168_v26 = vand.u32 4294901760, %v167_v16 }
  0x16   :  { %1061 = vmatpush3.bf16.msra.mxu1 %v1364_v36  ;;  %1133 = vmatpush3.bf16.msra.mxu0 %v1364_v36  ;;  %v128_v63 = vsub.f32 %v1386_v44, %v127_v55  ;;  %v175_v28 = vand.u32 4294901760, %v174_v17  ;;  %v194_v29 = vand.u32 4294901760, %v1456_v8  ;;  %v1075_v32 = vpack.c.bf16 %v161_v19, %v154_v15 }
  0x17   :  { %1062 = vmatprep.subr.bf16.mxu1 %v1232_v3  ;;  %1134 = vmatprep.subr.bf16.mxu0 %v1232_v3  ;;  %v181_v49 = vsub.f32 %v1435_v61, %v180_v21  ;;  %v188_v30 = vsub.f32 %v1438_v62, %v187_v22  ;;  %v201_v37 = vand.u32 4294901760, %v1459_v9  ;;  %v1488_v31 = vsub.f32 %v1371_v39, %v81_v43 }
  0x18   :  { %v129_v14 = vand.u32 4294901760, %v128_v63  ;;  %v1493_v38 = vsub.f32 %v1378_v40, %v84_v46  ;;  %v1150_v50 = vpack.c.bf16 %v173_v2, %v166_v1  ;;  %v208_v56 = vand.u32 4294901760, %v1472_v23 }
  0x19   :  { %v215_v58 = vand.u32 4294901760, %v1477_v24  ;;  %v1078_v39 = vpack.c.bf16 %v175_v28, %v168_v26  ;;  %v182_v43 = vand.u32 4294901760, %v181_v49  ;;  %v189_v59 = vand.u32 4294901760, %v188_v30 }
  0x1a   :  { %1064 = vmatpush3.bf16.msra.mxu1 %v1394_v45  ;;  %1136 = vmatpush3.bf16.msra.mxu0 %v1394_v45  ;;  %v202_v40 = vsub.f32 %v1459_v9, %v201_v37  ;;  %v1508_v46 = vsub.f32 %v1400_v47, %v87_v53  ;;  %v1513_v60 = vsub.f32 %v1405_v48, %v90_v54  ;;  %v222_v7 = vand.u32 4294901760, %v1488_v31 }
  0x1b   :  { %1065 = vmatprep.subr.bf16.mxu1 %v1232_v3  ;;  %1137 = vmatprep.subr.bf16.mxu0 %v1232_v3  ;;  %v1153_v63 = vpack.c.bf16 %v187_v22, %v180_v21  ;;  %v209_v1 = vsub.f32 %v1472_v23, %v208_v56  ;;  %v216_v2 = vsub.f32 %v1477_v24, %v215_v58  ;;  %v229_v47 = vand.u32 4294901760, %v1493_v38 }
  0x1c   :  { %v1081_v5 = vpack.c.bf16 %v189_v59, %v182_v43  ;;  %v203_v6 = vand.u32 4294901760, %v202_v40  ;;  %v1156_v48 = vpack.c.bf16 %v201_v37, %v194_v29  ;;  %v223_v15 = vsub.f32 %v1488_v31, %v222_v7 }
  0x1d   :  { %v210_v53 = vand.u32 4294901760, %v209_v1  ;;  %v217_v54 = vand.u32 4294901760, %v216_v2  ;;  %v230_v16 = vsub.f32 %v1493_v38, %v229_v47  ;;  %v243_v17 = vand.u32 4294901760, %v1513_v60 }
  0x1e   :  { %1067 = vmatpush3.bf16.msra.mxu1 %v1427_v57  ;;  %1139 = vmatpush3.bf16.msra.mxu0 %v1427_v57  ;;  %v1159_v19 = vpack.c.bf16 %v215_v58, %v208_v56  ;;  %v224_v21 = vand.u32 4294901760, %v223_v15  ;;  %vm708_vm4 = vcmask 31744  }
  0x1f   :  { %1068 = vmatprep.subr.bf16.mxu1 %v1232_v3  ;;  %1140 = vmatprep.subr.bf16.mxu0 %v1232_v3  ;;  %v231_v22 = vand.u32 4294901760, %v230_v16  ;;  %v244_v26 = vsub.f32 %v1513_v60, %v243_v17 }
  0x21   :  { %v1090_v28 = vpack.c.bf16 %v231_v22, %v224_v21  ;;  %v245_v49 = vand.u32 4294901760, %v244_v26 }
  0x22   :  { %1070 = vmatpush3.bf16.msra.mxu1 %v1450_v4  ;;  %1142 = vmatpush3.bf16.msra.mxu0 %v1450_v4 }
  0x23   :  { %1071 = vmatprep.subr.bf16.mxu1 %v1232_v3  ;;  %1143 = vmatprep.subr.bf16.mxu0 %v1232_v3 }
  0x25   :  { %870 = vmatmul.mubr.f32.vlgmr.msra.gmra.mrb[0].mxu1 %v129_v14  ;;  %975 = vmatmul.mubr.f32.vlgmr.msra.gmra.mrb[0].mxu0 %v127_v55  ;;  %v195_v55 = vsub.f32 %v1456_v8, %v194_v29  ;;  %v1162_v29 = vpack.c.bf16 %v229_v47, %v222_v7 }
  0x26   :  { %1073 = vmatpush3.bf16.msra.mxu1 %v1072_v18  ;;  %1145 = vmatpush3.bf16.msra.mxu0 %v1144_v10  ;;  %v236_v10 = vand.u32 4294901760, %v1508_v46  ;;  %v1087_v18 = vpack.c.bf16 %v217_v54, %v210_v53 }
  0x27   :  { %1074 = vmatprep.subr.bf16.mxu1 %v1232_v3  ;;  %1146 = vmatprep.subr.bf16.mxu0 %v1232_v3  ;;  %v196_v0 = vand.u32 4294901760, %v195_v55  ;;  %v1099_v55 = vpack.c.bf16 %v1382_v42, %v1380_v41 }
  0x28   :  { %904 = vmatprep.mubr.msk.f32.mxu1 %vm1233_vm0, %v1234_v11  ;;  %1009 = vmatprep.mubr.msk.f32.mxu0 %vm1233_vm0, %v1234_v11  ;;  %v1165_v37 = vpack.c.bf16 %v243_v17, %v236_v10 }
  0x29   :  { %v1084_v14 = vpack.c.bf16 %v203_v6, %v196_v0 }
  0x2a   :  { %1076 = vmatpush3.bf16.msra.mxu1 %v1075_v32  ;;  %1148 = vmatpush3.bf16.msra.mxu0 %v1147_v25  ;;  %v237_v25 = vsub.f32 %v1508_v46, %v236_v10 }
  0x2b   :  { %1077 = vmatprep.subr.bf16.mxu1 %v1232_v3  ;;  %1149 = vmatprep.subr.bf16.mxu0 %v1232_v3 }
  0x2c   :  { %v238_v32 = vand.u32 4294901760, %v237_v25 }
  0x2e   :  { %1079 = vmatpush3.bf16.msra.mxu1 %v1078_v39  ;;  %1151 = vmatpush3.bf16.msra.mxu0 %v1150_v50  ;;  %v1093_v30 = vpack.c.bf16 %v245_v49, %v238_v32  ;;  %v1096_v50 = vpack.c.bf16 %v1360_v35, %v1356_v33  ;;  %v1102_v33 = vpack.c.bf16 %v1415_v52, %v1412_v51 }
  0x2f   :  { %1080 = vmatprep.subr.bf16.mxu1 %v1232_v3  ;;  %1152 = vmatprep.subr.bf16.mxu0 %v1232_v3 }
  0x32   :  { %1082 = vmatpush3.bf16.msra.mxu1 %v1081_v5  ;;  %1154 = vmatpush3.bf16.msra.mxu0 %v1153_v63 }
  0x33   :  { %1083 = vmatprep.subr.bf16.mxu1 %v1232_v3  ;;  %1155 = vmatprep.subr.bf16.mxu0 %v1232_v3 }
  0x36   :  { %1085 = vmatpush3.bf16.msra.mxu1 %v1084_v14  ;;  %1157 = vmatpush3.bf16.msra.mxu0 %v1156_v48 }
  0x37   :  { %1086 = vmatprep.subr.bf16.mxu1 %v1232_v3  ;;  %1158 = vmatprep.subr.bf16.mxu0 %v1232_v3 }
  0x3a   :  { %1088 = vmatpush3.bf16.msra.mxu1 %v1087_v18  ;;  %1160 = vmatpush3.bf16.msra.mxu0 %v1159_v19 }
  0x3b   :  { %1089 = vmatprep.subr.bf16.mxu1 %v1232_v3  ;;  %1161 = vmatprep.subr.bf16.mxu0 %v1232_v3 }
  0x3e   :  { %1091 = vmatpush3.bf16.msra.mxu1 %v1090_v28  ;;  %1163 = vmatpush3.bf16.msra.mxu0 %v1162_v29 }
  0x3f   :  { %1092 = vmatprep.subr.bf16.mxu1 %v1232_v3  ;;  %1164 = vmatprep.subr.bf16.mxu0 %v1232_v3 }
  0x42   :  { %1094 = vmatpush3.bf16.msra.mxu1 %v1093_v30  ;;  %1166 = vmatpush3.bf16.msra.mxu0 %v1165_v37 }
  0x43   :  { %1095 = vmatprep.subr.bf16.mxu1 %v1232_v3  ;;  %1167 = vmatprep.subr.bf16.mxu0 %v1232_v3 }
  0x45   :  { %905 = vmatmul.mubr.f32.vlgmr.msra.gmra.mrb[0].mxu1 %v1358_v34  ;;  %1010 = vmatmul.mubr.f32.vlgmr.msra.gmra.mrb[0].mxu0 %v1358_v34 }
  0x46   :  { %1097 = vmatpush3.bf16.msra.mxu1 %v1096_v50  ;;  %1169 = vmatpush3.bf16.msra.mxu0 %v1294_v12  ;;  %v1105_v12 = vpack.c.bf16 %v1438_v62, %v1435_v61 }
  0x47   :  { %1098 = vmatprep.subr.bf16.mxu1 %v1232_v3  ;;  %1170 = vmatprep.subr.bf16.mxu0 %v1232_v3 }
  0x48   :  { %939 = vmatprep.mubr.msk.f32.mxu1 %vm1233_vm0, %v1234_v11  ;;  %1044 = vmatprep.mubr.msk.f32.mxu0 %vm1233_vm0, %v1234_v11  ;;  %v1108_v11 = vpack.c.bf16 %v1459_v9, %v1456_v8 }
  0x4a   :  { %1100 = vmatpush3.bf16.msra.mxu1 %v1099_v55  ;;  %1172 = vmatpush3.bf16.msra.mxu0 %v1298_v13  ;;  %v1111_v13 = vpack.c.bf16 %v1477_v24, %v1472_v23 }
  0x4b   :  { %1101 = vmatprep.subr.bf16.mxu1 %v1232_v3  ;;  %1173 = vmatprep.subr.bf16.mxu0 %v1232_v3 }
  0x4e   :  { %1103 = vmatpush3.bf16.msra.mxu1 %v1102_v33  ;;  %1175 = vmatpush3.bf16.msra.mxu0 %v1322_v20  ;;  %v1114_v20 = vpack.c.bf16 %v1493_v38, %v1488_v31 }
  0x4f   :  { %1104 = vmatprep.subr.bf16.mxu1 %v1232_v3  ;;  %1176 = vmatprep.subr.bf16.mxu0 %v1232_v3 }
  0x52   :  { %1106 = vmatpush3.bf16.msra.mxu1 %v1105_v12  ;;  %1178 = vmatpush3.bf16.msra.mxu0 %v1340_v27  ;;  %v1117_v27 = vpack.c.bf16 %v1513_v60, %v1508_v46 }
  0x53   :  { %1107 = vmatprep.subr.bf16.mxu1 %v1232_v3  ;;  %1179 = vmatprep.subr.bf16.mxu0 %v1232_v3 }
  0x56   :  { %1109 = vmatpush3.bf16.msra.mxu1 %v1108_v11  ;;  %1181 = vmatpush3.bf16.msra.mxu0 %v1364_v36 }
  0x57   :  { %1110 = vmatprep.subr.bf16.mxu1 %v1232_v3  ;;  %1182 = vmatprep.subr.bf16.mxu0 %v1232_v3 }
  0x5a   :  { %1112 = vmatpush3.bf16.msra.mxu1 %v1111_v13  ;;  %1184 = vmatpush3.bf16.msra.mxu0 %v1394_v45 }
  0x5b   :  { %1113 = vmatprep.subr.bf16.mxu1 %v1232_v3  ;;  %1185 = vmatprep.subr.bf16.mxu0 %v1232_v3 }
  0x5e   :  { %1115 = vmatpush3.bf16.msra.mxu1 %v1114_v20  ;;  %1187 = vmatpush3.bf16.msra.mxu0 %v1427_v57 }
  0x5f   :  { %1116 = vmatprep.subr.bf16.mxu1 %v1232_v3  ;;  %1188 = vmatprep.subr.bf16.mxu0 %v1232_v3  ;;  %v693_v3 = vstv %s1601_s0  ;;  %s1235_s0 = smov [#allocation3]  }
  0x62   :  { %1118 = vmatpush3.bf16.msra.mxu1 %v1117_v27  ;;  %1190 = vmatpush3.bf16.msra.mxu0 %v1450_v4 }
  0x65   :  { %940 = vmatmul.mubr.f32.vlgmr.msra.gmra.mrb[0].mxu1 %v1386_v44  ;;  %1045 = vmatmul.mubr.f32.vlgmr.msra.gmra.mrb[0].mxu0 %v1358_v34  ;;  %v692_v34 = vld [vmem:[%s1604_s3] sm:$0xff]  ;;  %v702_v44 = vlaneseq  ;;  %s727_s3 = sshll.u32 %s1235_s0, 4  ;;  %s728_s3 = int_to_ptr.vmem [resolvable:$true] %s727_s3 }
  0x66   :  { %v696_v9 = vsub.f32 1.0, %v692_v34  ;;  %s1208_s6 = scalar_lea.vmem %s728_s3, 128  ;;  %p1213_p1 = scmp.lt.s32.totalorder %s728_s3, %s728_s3 }
  0x67   :  { %v703_v23 = vshrl.u32 %v702_v44, 7  ;;  %p1209_p0 = scmp.ne.s32.totalorder %s728_s3, %s1208_s6  ;;  %p1214_p2 = scmp.lt.s32.totalorder %s1208_s6, %s1208_s6 }
  0x69   :  { %vm706_vm3 = vcmp.lt.s32.totalorder %v703_v23, 2  ;;  %p1215_p3 = por %p1214_p2, %p1213_p1 }
  0x6b   :  { %p1216_p4 = pnand %p1215_p3, %p1209_p0 }
 0x138   :  { %v386_v35 = vpop.f32.mrb[0].mxu1  ;;  %v681_v36 = vpop.f32.mrb[0].mxu0 }
 0x139   :  { %v1191_v41 = vadd.f32 %v681_v36, %v386_v35  ;;  %v941_v42 = vpop.f32.mrb[1].mxu1  ;;  %v1046_v45 = vpop.f32.mrb[1].mxu0 }
 0x13b   :  { %1206 = vrsqrt.f32 %v1191_v41  ;;  %vm687_vm1 = vcmp.eq.f32.partialorder %v1191_v41, inf  ;;  %v690_v57 = vand.u32 2147483648, %v1191_v41  ;;  %vm689_vm2 = vcmp.eq.f32.partialorder %v1191_v41, 0.0 }
 0x13c   :  { %v697_v31 = vmul.f32 %v1191_v41, %v696_v9 }
 0x145   :  { %v1207_v51 = vpop.eup %1206 }
 0x146   :  { %v686_v52 = vmul.f32 %v1207_v51, %v1191_v41 }
 0x148   :  { %v688_v61 = vsel %vm687_vm1, %v1191_v41, %v686_v52 }
 0x149   :  { %v691_v62 = vsel %vm689_vm2, %v690_v57, %v688_v61 }
 0x14a   :  { %v694_v4 = vsub.f32 %v693_v3, %v691_v62 }
 0x14c   :  { %v695_v8 = vmax.f32 %v694_v4, 0.0 }
 0x14e   :  { %v698_v24 = vmul.f32 %v695_v8, %v695_v8 }
 0x150   :  { %v699_v38 = vmul.f32 %v698_v24, %v692_v34 }
 0x152   :  { %v700_v56 = vadd.f32 %v699_v38, %v697_v31 }
 0x154   :  { %v707_v58 = vsel %vm706_vm3, %v700_v56, 0.0 }
 0x155   :  { %v709_v39 = vsel %vm708_vm4, %v707_v58, 0.0 }
 0x156   :  { %710 = vadd.xlane.f32.xlu0 %v709_v39 }
 0x1e3   :  { %v711_v43 = vpop.xlane.xlu0 %710 }
 0x1e4   :  { %v712_v59 = vrot.slane %v711_v43, 4 }
 0x1e6   :  { %v713_v40 = vadd.f32 %v712_v59, %v711_v43 }
 0x1e8   :  { %v714_v46 = vrot.slane %v713_v40, 2 }
 0x1ea   :  { %v715_v60 = vadd.f32 %v714_v46, %v713_v40 }
 0x1ec   :  { %v716_v63 = vrot.slane %v715_v60, 1 }
 0x1ee   :  { %v717_v0 = vadd.f32 %v716_v63, %v715_v60 }
 0x1f0   :  { %1200 = vpush %v717_v0 }
 0x221   :  { %s1201_s30 = spop %1200 }
 0x222   :  { %v719_v1 = vstv %s1201_s30 }
 0x223   :  { %720 = vst [vmem:[#allocation3] sm:$0xff] %v719_v1 }
 0x224   :  { %1219 = shalt.err (!%p1216_p4)
}
 0x225   :  { %s1220_s9 = scalar_lea.hbm %s1606_s5, 128 }
 0x226   :  { %p1221_p5 = scmp.ne.s32.totalorder %s1606_s5, %s1220_s9  ;;  %p1224_p6 = scmp.lt.u32.totalorder %s1220_s9, %s1606_s5 }
 0x228   :  { %p1226_p7 = pnand %p1224_p6, %p1221_p5 }
 0x22a   :  { %1229 = shalt.err (!%p1226_p7)
}
 0x22b   :  { %730 = dma.vmem_to_hbm [thread:$0]  %s728_s3, 128, %s1606_s5, [#allocation4]  }
 0x22c   :  { %1230 = dma.done.wait [#allocation4], 128  }
 0x22d   :  { %1231 = vsyncadd [#allocation4], 4294967168 }
 0x22e   :  { %734 = vsyncpa [#allocation4], 1 }

</bundles_post_ra>
